<compile_context>
chip_gen: v7x
topology: tpu7x:2x2x1
jax: 0.10.0
libtpu: 0.0.40
codegen_flags: <defaults>
</compile_context>

<pallas_src>
import jax
import jax.numpy as jnp
from jax.experimental import pallas as pl
from jax.experimental.pallas import tpu as pltpu

LANES = 128      # vreg lane width (fast axis)
SUBLANES = 8     # f32 sublane tile (slow axis)


def _round_up(v, m):
    return (v + m - 1) // m * m


# ------------------------------- kernels -----------------------------------


def _linear_add_kernel(x_ref, w_ref, b_ref, other_ref, o_ref):
    # Fused MXU matmul (block-diagonal weight) + bias + residual on the VPU.
    y = jnp.dot(x_ref[...], w_ref[...], preferred_element_type=jnp.float32)
    o_ref[...] = (y + b_ref[...] + other_ref[...]).astype(o_ref.dtype)


def _linear_add_randn_kernel(seed_ref, x_ref, w_ref, b_ref, o_ref):
    # `other = randn_like(x)` generated in-kernel: no HBM stream for it.
    pltpu.prng_seed(seed_ref[0] + pl.program_id(0))
    noise = pltpu.stateful_normal(o_ref.shape, jnp.float32)
    y = jnp.dot(x_ref[...], w_ref[...], preferred_element_type=jnp.float32)
    o_ref[...] = (y + b_ref[...] + noise).astype(o_ref.dtype)


# ------------------------------- wrappers ----------------------------------


def pack_params(w, b):
    """w:(IN,OUT), b:(OUT,) -> ((128,128) block-diag weight, (1,128) bias, pack)."""
    IN, OUT = w.shape
    assert IN == OUT and LANES % IN == 0, "block-diag packing needs IN==OUT | 128"
    pack = LANES // IN
    w_bd = jnp.kron(jnp.eye(pack, dtype=jnp.float32), w.astype(jnp.float32))
    b_tiled = jnp.tile(b.astype(jnp.float32).reshape(1, OUT), (1, pack))
    return w_bd, b_tiled, pack


def _batch_geometry(B, pack, block_rows):
    rows = -(-B // pack)                       # reshaped rows needed
    rows_p = _round_up(rows, SUBLANES)
    tm = min(block_rows, rows_p)               # both multiples of 8
    rows_p = _round_up(rows_p, tm)
    return rows_p, tm, rows_p * pack           # rows, batch tile, padded batch


def _pad_and_pack_rows(a, B_p, rows_p):
    B = a.shape[0]
    a = a.astype(jnp.float32)
    if B_p != B:
        a = jnp.pad(a, ((0, B_p - B), (0, 0)))
    return a.reshape(rows_p, LANES)            # free row-major view


def linear_add(x, w_bd, b_tiled, pack, other, *, block_rows=512):
    """y = x @ W + b + other, via lane packing + block-diagonal weight."""
    B = x.shape[0]
    out_feat = LANES // pack
    rows_p, tm, B_p = _batch_geometry(B, pack, block_rows)

    x_r = _pad_and_pack_rows(x, B_p, rows_p)
    other_r = _pad_and_pack_rows(other, B_p, rows_p)

    out_r = pl.pallas_call(
        _linear_add_kernel,
        out_shape=jax.ShapeDtypeStruct((rows_p, LANES), jnp.float32),
        grid=(rows_p // tm,),
        in_specs=[
            pl.BlockSpec((tm, LANES), lambda i: (i, 0)),       # x (batch tiled)
            pl.BlockSpec((LANES, LANES), lambda i: (0, 0)),    # W (invariant)
            pl.BlockSpec((1, LANES), lambda i: (0, 0)),        # b (invariant)
            pl.BlockSpec((tm, LANES), lambda i: (i, 0)),       # other
        ],
        out_specs=pl.BlockSpec((tm, LANES), lambda i: (i, 0)),
        compiler_params=pltpu.CompilerParams(
            dimension_semantics=("parallel",)),
    )(x_r, w_bd, b_tiled, other_r)

    out = out_r.reshape(B_p, out_feat)
    return out[:B] if B_p != B else out


def linear_add_randn(x, w_bd, b_tiled, pack, *, seed=1, block_rows=512):
    """y = x @ W + b + randn_like(x), noise drawn by the in-kernel PRNG."""
    B = x.shape[0]
    out_feat = LANES // pack
    rows_p, tm, B_p = _batch_geometry(B, pack, block_rows)

    x_r = _pad_and_pack_rows(x, B_p, rows_p)
    seed_arr = jnp.asarray([seed], dtype=jnp.int32)

    grid_spec = pltpu.PrefetchScalarGridSpec(
        num_scalar_prefetch=1,
        grid=(rows_p // tm,),
        in_specs=[
            pl.BlockSpec((tm, LANES), lambda i, s: (i, 0)),
            pl.BlockSpec((LANES, LANES), lambda i, s: (0, 0)),
            pl.BlockSpec((1, LANES), lambda i, s: (0, 0)),
        ],
        out_specs=pl.BlockSpec((tm, LANES), lambda i, s: (i, 0)),
    )
    out_r = pl.pallas_call(
        _linear_add_randn_kernel,
        out_shape=jax.ShapeDtypeStruct((rows_p, LANES), jnp.float32),
        grid_spec=grid_spec,
        compiler_params=pltpu.CompilerParams(
            dimension_semantics=("arbitrary",)),
    )(seed_arr, x_r, w_bd, b_tiled)

    out = out_r.reshape(B_p, out_feat)
    return out[:B] if B_p != B else out


class PallasModel:
    """Mirrors Model.__init__ / forward with deterministic parameters."""

    def __init__(self, in_features=16, out_features=16, key=None):
        if key is None:
            key = jax.random.PRNGKey(42)
        kw, kb = jax.random.split(key)
        bound = 1.0 / (in_features ** 0.5)
        w = jax.random.uniform(kw, (out_features, in_features),
                               jnp.float32, -bound, bound)
        b = jax.random.uniform(kb, (out_features,), jnp.float32, -bound, bound)
        self.w_t = jnp.transpose(w)                          # (IN, OUT)
        self.b = b                                           # (OUT,)
        self.w_bd, self.b_tiled, self.pack = pack_params(self.w_t, b)

    def __call__(self, x, other=None, *, seed=1):
        if other is None:
            try:
                out = linear_add_randn(x, self.w_bd, self.b_tiled, self.pack,
                                       seed=seed)
                return jax.block_until_ready(out)
            except Exception:
                # TODO(synk): host-side fallback if the in-kernel stateful
                # PRNG helpers are unavailable in this JAX build.
                other = jax.random.normal(jax.random.PRNGKey(seed),
                                          x.shape, jnp.float32)
        return linear_add(x, self.w_bd, self.b_tiled, self.pack, other)


if __name__ == "__main__":
    key = jax.random.PRNGKey(0)
    kx, ko, kp, kxb, kob, kxr = jax.random.split(key, 6)

    model = PallasModel(in_features=16, out_features=16, key=kp)

    # --- Spec-sized check with explicit `other` (deterministic) -----------
    x = jax.random.normal(kx, (1, 16), jnp.float32)
    other = jax.random.normal(ko, (1, 16), jnp.float32)
    out = jax.block_until_ready(model(x, other))
    ref = jnp.dot(x, model.w_t, precision="highest") + model.b.reshape(1, -1) + other
    assert out.shape == (1, 16)
    assert jnp.allclose(out, ref, atol=2e-2, rtol=1e-2), "spec-size mismatch"

    # --- Batched, multi-step-grid check (exercises padding + tiling) ------
    xb = jax.random.normal(kxb, (2000, 16), jnp.float32)
    otherb = jax.random.normal(kob, (2000, 16), jnp.float32)
    outb = jax.block_until_ready(
        linear_add(xb, model.w_bd, model.b_tiled, model.pack, otherb,
                   block_rows=64))
    refb = (jnp.dot(xb, model.w_t, precision="highest")
            + model.b.reshape(1, -1) + otherb)
    assert outb.shape == (2000, 16)
    assert jnp.allclose(outb, refb, atol=2e-2, rtol=1e-2), "batched mismatch"

    # --- randn_like path (other=None): shape + loose noise statistics -----
    xr = jax.random.normal(kxr, (4096, 16), jnp.float32)
    outr = jax.block_until_ready(model(xr, seed=7))
    noise = outr - (jnp.dot(xr, model.w_t, precision="highest")
                    + model.b.reshape(1, -1))
    assert outr.shape == (4096, 16)
    assert bool(jnp.all(jnp.isfinite(outr)))
    assert abs(float(noise.mean())) < 0.1
    assert 0.85 < float(noise.std()) < 1.15

    print("KERNEL_OK")
</pallas_src>

<mosaic_0001>
module attributes {stable_mosaic.version = 11 : i64} {
  func.func @_linear_add_kernel(%arg0: i32, %arg1: memref<8x128xf32, #tpu.memory_space<vmem>>, %arg2: memref<128x128xf32, #tpu.memory_space<vmem>>, %arg3: memref<1x128xf32, #tpu.memory_space<vmem>>, %arg4: memref<8x128xf32, #tpu.memory_space<vmem>>, %arg5: memref<8x128xf32, #tpu.memory_space<vmem>>) attributes {dimension_semantics = [#tpu.dimension_semantics<parallel>], iteration_bounds = array<i64: 1>, scalar_prefetch = 0 : i64, scratch_operands = 0 : i64, tpu.core_type = #tpu.core_type<tc>, window_params = [{transform_indices = @transform_0, window_bounds = array<i64: 8, 128>}, {pipeline_mode = #tpu.pipeline_mode<synchronous>, transform_indices = @transform_1, window_bounds = array<i64: 128, 128>}, {pipeline_mode = #tpu.pipeline_mode<synchronous>, transform_indices = @transform_2, window_bounds = array<i64: 1, 128>}, {transform_indices = @transform_3, window_bounds = array<i64: 8, 128>}, {transform_indices = @transform_4, window_bounds = array<i64: 8, 128>}]} {
    %c0 = arith.constant 0 : index
    %c0_0 = arith.constant 0 : index
    %0 = vector.load %arg1[%c0, %c0_0] : memref<8x128xf32, #tpu.memory_space<vmem>>, vector<8x128xf32>
    %c0_1 = arith.constant 0 : index
    %c0_2 = arith.constant 0 : index
    %1 = vector.load %arg2[%c0_1, %c0_2] : memref<128x128xf32, #tpu.memory_space<vmem>>, vector<128x128xf32>
    %cst = arith.constant dense<0.000000e+00> : vector<8x128xf32>
    %2 = tpu.matmul %0, %1, %cst {dimension_numbers = #tpu.dot_dimension_numbers<[1], [0], [0], [1], [0, 0, 1, 1], [], []>} : vector<8x128xf32>, vector<128x128xf32>, vector<8x128xf32> -> vector<8x128xf32>
    %c0_3 = arith.constant 0 : index
    %c0_4 = arith.constant 0 : index
    %3 = vector.load %arg3[%c0_3, %c0_4] : memref<1x128xf32, #tpu.memory_space<vmem>>, vector<1x128xf32>
    %4 = vector.broadcast %3 : vector<1x128xf32> to vector<8x128xf32>
    %5 = arith.addf %2, %4 : vector<8x128xf32>
    %c0_5 = arith.constant 0 : index
    %c0_6 = arith.constant 0 : index
    %6 = vector.load %arg4[%c0_5, %c0_6] : memref<8x128xf32, #tpu.memory_space<vmem>>, vector<8x128xf32>
    %7 = arith.addf %5, %6 : vector<8x128xf32>
    %c0_7 = arith.constant 0 : index
    %c0_8 = arith.constant 0 : index
    %8 = vector.load %arg5[%c0_7, %c0_8] : memref<8x128xf32, #tpu.memory_space<vmem>>, vector<8x128xf32>
    tpu.vector_store %arg5[%c0_7, %c0_8], %7 {strides = array<i32>} : memref<8x128xf32, #tpu.memory_space<vmem>>, vector<8x128xf32>,
    return
  }
  func.func @transform_0(%arg0: i32) -> (i32, i32) {
    %c0_i32 = arith.constant 0 : i32
    %c0_i32_0 = arith.constant 0 : i32
    return %arg0, %c0_i32 : i32, i32
  }
  func.func @transform_1(%arg0: i32) -> (i32, i32) {
    %c0_i32 = arith.constant 0 : i32
    %c0_i32_0 = arith.constant 0 : i32
    %c0_i32_1 = arith.constant 0 : i32
    return %c0_i32, %c0_i32_0 : i32, i32
  }
  func.func @transform_2(%arg0: i32) -> (i32, i32) {
    %c0_i32 = arith.constant 0 : i32
    %c0_i32_0 = arith.constant 0 : i32
    %c0_i32_1 = arith.constant 0 : i32
    return %c0_i32, %c0_i32_0 : i32, i32
  }
  func.func @transform_3(%arg0: i32) -> (i32, i32) {
    %c0_i32 = arith.constant 0 : i32
    %c0_i32_0 = arith.constant 0 : i32
    return %arg0, %c0_i32 : i32, i32
  }
  func.func @transform_4(%arg0: i32) -> (i32, i32) {
    %c0_i32 = arith.constant 0 : i32
    %c0_i32_0 = arith.constant 0 : i32
    return %arg0, %c0_i32 : i32, i32
  }
}

</mosaic_0001>

<bundles_post_ra>
// kernel: tpu_custom_call.1
= control target key start
LH: loop header
LB: loop body
LE: loop exit
PB: predicated region body
PF: predicated region fallthrough
CT: control target
= control target key end

     0   :  { %9 = vsyncpa [#allocation3], 0  ;;  %s396_s0 = inlined_call_operand.hbm [shape: f32[8,128], index: 0, kind: input, shape index: {}]   ;;  %s397_s1 = inlined_call_operand.hbm [shape: f32[128,128], index: 1, kind: input, shape index: {}]   ;;  %s398_s2 = inlined_call_operand.vmem [shape: f32[1,128], index: 2, kind: input, shape index: {}]   ;;  %s399_s3 = inlined_call_operand.vmem [shape: f32[8,128], index: 3, kind: input, shape index: {}]   ;;  %s400_s4 = inlined_call_operand.hbm [shape: f32[8,128], index: 4, kind: output, shape index: {}]  }
   0x1   :  { %10 = vsyncpa [#allocation6], 0 }
   0x2   :  { %11 = vsyncpa [#allocation4], 0  ;;  %s314_s15 = smov [#allocation2]   ;;  %s315_s17 = smov [#allocation5]  }
   0x3   :  { %s18_s16 = sshll.u32 %s314_s15, 4  ;;  %s27_s18 = sshll.u32 %s315_s17, 4  ;;  %s19_s16 = int_to_ptr.vmem [resolvable:$true] %s18_s16  ;;  %s347_s18 = int_to_ptr.vmem [resolvable:$true] %s27_s18 }
   0x4   :  { %s242_s21 = scalar_lea.hbm %s396_s0, 128 }
   0x5   :  { %p243_p0 = scmp.ne.s32.totalorder %s396_s0, %s242_s21  ;;  %p246_p1 = scmp.lt.u32.totalorder %s242_s21, %s396_s0 }
   0x7   :  { %p248_p2 = pnand %p246_p1, %p243_p0 }
   0x9   :  { %251 = shalt.err (!%p248_p2)
}
   0xa   :  { %s252_s26 = scalar_lea.vmem %s19_s16, 128  ;;  %p257_p4 = scmp.lt.s32.totalorder %s19_s16, %s19_s16 }
   0xb   :  { %p253_p3 = scmp.ne.s32.totalorder %s19_s16, %s252_s26  ;;  %p258_p5 = scmp.lt.s32.totalorder %s252_s26, %s252_s26 }
   0xd   :  { %p259_p6 = por %p258_p5, %p257_p4 }
   0xf   :  { %p260_p7 = pnand %p259_p6, %p253_p3 }
  0x11   :  { %263 = shalt.err (!%p260_p7)
}
  0x12   :  { %21 = dma.hbm_to_vmem [thread:$0]  %s396_s0, 128, %s19_s16, [#allocation3]  }
  0x13   :  { %s264_s5 = scalar_lea.hbm %s397_s1, 2048 }
  0x14   :  { %p265_p8 = scmp.ne.s32.totalorder %s397_s1, %s264_s5  ;;  %p268_p9 = scmp.lt.u32.totalorder %s264_s5, %s397_s1 }
  0x16   :  { %p270_p10 = pnand %p268_p9, %p265_p8 }
  0x18   :  { %273 = shalt.err (!%p270_p10)
}
  0x19   :  { %s274_s10 = scalar_lea.vmem %s347_s18, 2048  ;;  %p279_p12 = scmp.lt.s32.totalorder %s347_s18, %s347_s18 }
  0x1a   :  { %p275_p11 = scmp.ne.s32.totalorder %s347_s18, %s274_s10  ;;  %p280_p13 = scmp.lt.s32.totalorder %s274_s10, %s274_s10 }
  0x1c   :  { %p281_p0 = por %p280_p13, %p279_p12 }
  0x1e   :  { %p282_p1 = pnand %p281_p0, %p275_p11 }
  0x20   :  { %285 = shalt.err (!%p282_p1)
}
  0x21   :  { %s316_s0 = smov 128   ;;  %s317_s11 = smov 8  }
  0x22   :  { %33 = dma.hbm_to_vmem [thread:$0]  %s397_s1, 2048, %s347_s18, [#allocation6], %s316_s0, %s316_s0, %s317_s11  }
  0x23   :  { %308 = dma.done.wait [#allocation3], 128  }
  0x24   :  { %309 = vsyncadd [#allocation3], 4294967168 }
  0x25   :  { %310 = dma.done.wait [#allocation6], 2048  }
  0x26   :  { %311 = vsyncadd [#allocation6], 4294965248  ;;  %v318_v0 = vmov 0.0|0.0   ;;  %vm319_vm0 = vmmov 0   ;;  %v320_v1 = vmov 0.0   ;;  %v45_v2 = vld [vmem:[#allocation5] sm:$0xff] }
  0x27   :  { %210 = vmatprep.subr.bf16.mxu0 %v318_v0  ;;  %207 = vmatprep.mubr.msk.f32.mxu0 %vm319_vm0, %v320_v1  ;;  %v46_v3 = vld [vmem:[#allocation5 + $0x8] sm:$0xff]  ;;  %v47_v4 = vld [vmem:[#allocation5 + $0x10] sm:$0xff]  ;;  %v48_v6 = vld [vmem:[#allocation5 + $0x18] sm:$0xff]  ;;  %s321_s17 = smov [#allocation7]  }
  0x28   :  { %v211_v5 = vpack.c.bf16 %v46_v3, %v45_v2  ;;  %v214_v7 = vpack.c.bf16 %v48_v6, %v47_v4  ;;  %v49_v8 = vld [vmem:[#allocation5 + $0x20] sm:$0xff]  ;;  %v50_v9 = vld [vmem:[#allocation5 + $0x28] sm:$0xff]  ;;  %v51_v11 = vld [vmem:[#allocation5 + $0x30] sm:$0xff]  ;;  %s147_s18 = sshll.u32 %s321_s17, 4  ;;  %s148_s18 = int_to_ptr.vmem [resolvable:$true] %s147_s18 }
  0x29   :  { %v217_v10 = vpack.c.bf16 %v50_v9, %v49_v8  ;;  %v52_v12 = vld [vmem:[#allocation5 + $0x38] sm:$0xff]  ;;  %v53_v14 = vld [vmem:[#allocation5 + $0x40] sm:$0xff]  ;;  %v54_v15 = vld [vmem:[#allocation5 + $0x48] sm:$0xff]  ;;  %s286_s19 = scalar_lea.vmem %s148_s18, 128  ;;  %p291_p3 = scmp.lt.s32.totalorder %s148_s18, %s148_s18 }
  0x2a   :  { %212 = vmatpush3.bf16.msra.mxu0 %v211_v5  ;;  %v220_v13 = vpack.c.bf16 %v52_v12, %v51_v11  ;;  %v223_v16 = vpack.c.bf16 %v54_v15, %v53_v14  ;;  %v55_v17 = vld [vmem:[#allocation5 + $0x50] sm:$0xff]  ;;  %v56_v18 = vld [vmem:[#allocation5 + $0x58] sm:$0xff]  ;;  %v57_v20 = vld [vmem:[#allocation5 + $0x60] sm:$0xff]  ;;  %p287_p2 = scmp.ne.s32.totalorder %s148_s18, %s286_s19  ;;  %p292_p4 = scmp.lt.s32.totalorder %s286_s19, %s286_s19 }
  0x2b   :  { %213 = vmatprep.subr.bf16.mxu0 %v318_v0  ;;  %v226_v19 = vpack.c.bf16 %v56_v18, %v55_v17  ;;  %v58_v21 = vld [vmem:[#allocation5 + $0x68] sm:$0xff]  ;;  %v59_v23 = vld [vmem:[#allocation5 + $0x70] sm:$0xff]  ;;  %v60_v24 = vld [vmem:[#allocation5 + $0x78] sm:$0xff] }
  0x2c   :  { %v229_v22 = vpack.c.bf16 %v58_v21, %v57_v20  ;;  %v232_v25 = vpack.c.bf16 %v60_v24, %v59_v23  ;;  %v44_v26 = vld [vmem:[#allocation2] sm:$0xff]  ;;  %p293_p5 = por %p292_p4, %p291_p3 }
  0x2d   :  { %v157_v27 = vld [vmem:[%s398_s2] ss:$0 sm:$0xff] }
  0x2e   :  { %215 = vmatpush3.bf16.msra.mxu0 %v214_v7  ;;  %v138_v29 = vld [vmem:[%s399_s3] sm:$0xff]  ;;  %p294_p6 = pnand %p293_p5, %p287_p2 }
  0x2f   :  { %216 = vmatprep.subr.bf16.mxu0 %v318_v0 }
  0x32   :  { %218 = vmatpush3.bf16.msra.mxu0 %v217_v10 }
  0x33   :  { %219 = vmatprep.subr.bf16.mxu0 %v318_v0 }
  0x36   :  { %221 = vmatpush3.bf16.msra.mxu0 %v220_v13 }
  0x37   :  { %222 = vmatprep.subr.bf16.mxu0 %v318_v0 }
  0x3a   :  { %224 = vmatpush3.bf16.msra.mxu0 %v223_v16 }
  0x3b   :  { %225 = vmatprep.subr.bf16.mxu0 %v318_v0 }
  0x3e   :  { %227 = vmatpush3.bf16.msra.mxu0 %v226_v19 }
  0x3f   :  { %228 = vmatprep.subr.bf16.mxu0 %v318_v0 }
  0x42   :  { %230 = vmatpush3.bf16.msra.mxu0 %v229_v22 }
  0x43   :  { %231 = vmatprep.subr.bf16.mxu0 %v318_v0 }
  0x46   :  { %233 = vmatpush3.bf16.msra.mxu0 %v232_v25 }
  0x49   :  { %208 = vmatmul.mubr.f32.vlgmr.msra.gmra.mrb[0].mxu0 %v44_v26 }
 0x11c   :  { %v134_v28 = vpop.f32.mrb[0].mxu0 }
 0x11d   :  { %v135_v30 = vadd.f32 %v157_v27, %v134_v28  ;;  %v209_v31 = vpop.f32.mrb[1].mxu0 }
 0x11f   :  { %v139_v32 = vadd.f32 %v138_v29, %v135_v30 }
 0x121   :  { %140 = vst [vmem:[#allocation7] sm:$0xff] %v139_v32 }
 0x122   :  { %297 = shalt.err (!%p294_p6)
}
 0x123   :  { %s298_s21 = scalar_lea.hbm %s400_s4, 128 }
 0x124   :  { %p299_p7 = scmp.ne.s32.totalorder %s400_s4, %s298_s21  ;;  %p302_p8 = scmp.lt.u32.totalorder %s298_s21, %s400_s4 }
 0x126   :  { %p304_p9 = pnand %p302_p8, %p299_p7 }
 0x128   :  { %307 = shalt.err (!%p304_p9)
}
 0x129   :  { %150 = dma.vmem_to_hbm [thread:$0]  %s148_s18, 128, %s400_s4, [#allocation4]  }
 0x12a   :  { %312 = dma.done.wait [#allocation4], 128  }
 0x12b   :  { %313 = vsyncadd [#allocation4], 4294967168 }
 0x12c   :  { %154 = vsyncpa [#allocation3], 1 }
 0x12d   :  { %155 = vsyncpa [#allocation6], 1 }
 0x12e   :  { %156 = vsyncpa [#allocation4], 1 }

</bundles_post_ra>
